<compile_context>
chip_gen: v5e
topology: v5e:2x2
jax: 0.10.0
libtpu: 0.0.40
codegen_flags: <defaults>
</compile_context>

<pallas_src>
import functools

import jax
import jax.numpy as jnp
import numpy as np
from jax import lax
from jax.experimental import pallas as pl
from jax.experimental.pallas import tpu as pltpu


# ---------------------------------------------------------------------------
# Pallas kernel: Block = GroupNorm(groups, C) -> SiLU -> Conv2d(C, O, 3, pad=1)
# ---------------------------------------------------------------------------
def _block_kernel(x_ref, gamma_ref, beta_ref, pool_ref, w_ref, b_ref, mask_ref,
                  o_ref, *, spatial_w, eps):
    act = x_ref[0]                                   # (C, N) f32, N = H*W (lanes)
    n = act.shape[-1]

    # --- GroupNorm ---------------------------------------------------------
    ch_sum = jnp.sum(act, axis=-1, keepdims=True)             # (C, 1)
    ch_sumsq = jnp.sum(act * act, axis=-1, keepdims=True)     # (C, 1)
    pool = pool_ref[...]                                      # (C, C): group-average (incl. 1/count)
    mean_c = jnp.dot(pool, ch_sum, preferred_element_type=jnp.float32)   # (C, 1)
    msq_c = jnp.dot(pool, ch_sumsq, preferred_element_type=jnp.float32)  # (C, 1)
    var_c = msq_c - mean_c * mean_c
    y = (act - mean_c) * lax.rsqrt(var_c + eps)
    y = y * gamma_ref[...] + beta_ref[...]

    # --- SiLU ----------------------------------------------------------------
    a = y * jax.nn.sigmoid(y)

    # --- Conv2d 3x3, padding=1: 9 shifted (O,C)@(C,N) MXU matmuls -------------
    masks = mask_ref[...]                                     # (9, N) boundary validity
    d_out = o_ref.shape[1]
    acc = jnp.zeros((d_out, n), jnp.float32)
    for t in range(9):
        dh, dw = t // 3 - 1, t % 3 - 1
        k = dh * spatial_w + dw                  # flattened source offset for this tap
        if k == 0:
            shifted = a
        else:
            # shifted[:, i] = a[:, i + k]  (wrap-around positions are masked out below)
            shifted = pltpu.roll(a, shift=(-k) % n, axis=1)
        tap = jnp.dot(w_ref[t], shifted, preferred_element_type=jnp.float32)  # (O, N)
        acc = acc + tap * masks[t:t + 1, :]
    out = acc + b_ref[...]                                    # (O, 1) broadcast
    o_ref[0] = out.astype(o_ref.dtype)


# ---------------------------------------------------------------------------
# Wrappers
# ---------------------------------------------------------------------------
def block_forward(fmap, params, *, groups=8, eps=1e-5):
    """Block(dim_in, dim_out) forward via the Pallas kernel. fmap: (B, C, H, W) f32."""
    gamma, beta, w, bias = params
    B, C, H, W = fmap.shape
    N = H * W
    O = w.shape[0]
    assert C % groups == 0, "GroupNorm requires channels divisible by groups"

    x = fmap.reshape(B, C, N)

    # (C, C) group-average matrix (rows average over the row-channel's group).
    gid = np.arange(C) // (C // groups)
    pool = (gid[:, None] == gid[None, :]).astype(np.float32) / float((C // groups) * N)
    pool = jnp.asarray(pool)

    # Conv weight (O, C, 3, 3) -> (9, O, C); tap index t = kh * 3 + kw.
    w9 = jnp.transpose(w, (2, 3, 0, 1)).reshape(9, O, C)

    # Per-tap boundary masks over the flattened spatial axis.
    hh = np.arange(H)[:, None]
    ww = np.arange(W)[None, :]
    m = []
    for kh in range(3):
        for kw in range(3):
            dh, dw = kh - 1, kw - 1
            valid = ((hh + dh >= 0) & (hh + dh < H) &
                     (ww + dw >= 0) & (ww + dw < W))
            m.append(valid.reshape(-1))
    masks = jnp.asarray(np.stack(m).astype(np.float32))       # (9, N)

    kern = functools.partial(_block_kernel, spatial_w=W, eps=eps)
    out = pl.pallas_call(
        kern,
        out_shape=jax.ShapeDtypeStruct((B, O, N), jnp.float32),
        grid_spec=pltpu.PrefetchScalarGridSpec(
            num_scalar_prefetch=0,
            grid=(B,),
            in_specs=[
                pl.BlockSpec((1, C, N), lambda b: (b, 0, 0)),   # fmap slab (lane-dense)
                pl.BlockSpec((C, 1), lambda b: (0, 0)),         # gamma
                pl.BlockSpec((C, 1), lambda b: (0, 0)),         # beta
                pl.BlockSpec((C, C), lambda b: (0, 0)),         # group pooling matrix
                pl.BlockSpec((9, O, C), lambda b: (0, 0, 0)),   # conv taps
                pl.BlockSpec((O, 1), lambda b: (0, 0)),         # conv bias
                pl.BlockSpec((9, N), lambda b: (0, 0)),         # boundary masks
            ],
            out_specs=pl.BlockSpec((1, O, N), lambda b: (b, 0, 0)),
        ),
        compiler_params=pltpu.CompilerParams(
            dimension_semantics=("parallel",)),
    )(x, gamma.reshape(C, 1), beta.reshape(C, 1), pool, w9,
      bias.reshape(O, 1), masks)

    return out.reshape(B, O, H, W)


def resize_image_to(img, target_size):
    """Nearest-neighbour resize (matches F.interpolate(..., mode='nearest'))."""
    B, C, H, W = img.shape
    if H == target_size and W == target_size:
        return img
    hi = (np.arange(target_size) * H) // target_size
    wi = (np.arange(target_size) * W) // target_size
    return img[:, :, jnp.asarray(hi)[:, None], jnp.asarray(wi)[None, :]]


def upsample_combiner(x, fmaps=None, block_params=(), *, enabled=True):
    """UpsampleCombiner.forward."""
    fmaps = tuple(fmaps) if fmaps is not None else tuple()
    if not enabled or len(fmaps) == 0 or len(block_params) == 0:
        return x
    target_size = x.shape[-1]
    fmaps = [resize_image_to(f, target_size) for f in fmaps]
    outs = [block_forward(f, p) for f, p in zip(fmaps, block_params)]
    return jnp.concatenate([x, *outs], axis=1)


# ---------------------------------------------------------------------------
# Pure-JAX reference (mirrors the PyTorch module)
# ---------------------------------------------------------------------------
def _block_reference(fmap, params, *, groups=8, eps=1e-5):
    gamma, beta, w, bias = params
    B, C, H, W = fmap.shape
    xg = fmap.reshape(B, groups, C // groups, H, W)
    mean = xg.mean(axis=(2, 3, 4), keepdims=True)
    var = xg.var(axis=(2, 3, 4), keepdims=True)
    y = ((xg - mean) / jnp.sqrt(var + eps)).reshape(B, C, H, W)
    y = y * gamma[None, :, None, None] + beta[None, :, None, None]
    a = y * jax.nn.sigmoid(y)
    out = lax.conv_general_dilated(
        a, w, window_strides=(1, 1), padding=((1, 1), (1, 1)),
        dimension_numbers=('NCHW', 'OIHW', 'NCHW'))
    return out + bias[None, :, None, None]


def upsample_combiner_reference(x, fmaps=None, block_params=(), *, enabled=True):
    fmaps = tuple(fmaps) if fmaps is not None else tuple()
    if not enabled or len(fmaps) == 0 or len(block_params) == 0:
        return x
    target_size = x.shape[-1]
    fmaps = [resize_image_to(f, target_size) for f in fmaps]
    outs = [_block_reference(f, p) for f, p in zip(fmaps, block_params)]
    return jnp.concatenate([x, *outs], axis=1)


def init_block_params(key, dim_in, dim_out):
    ks = jax.random.split(key, 4)
    gamma = 1.0 + 0.1 * jax.random.normal(ks[0], (dim_in,), jnp.float32)
    beta = 0.1 * jax.random.normal(ks[1], (dim_in,), jnp.float32)
    w = 0.2 * jax.random.normal(ks[2], (dim_out, dim_in, 3, 3), jnp.float32)
    b = 0.1 * jax.random.normal(ks[3], (dim_out,), jnp.float32)
    return (gamma, beta, w, b)


if __name__ == "__main__":
    key = jax.random.PRNGKey(0)
    ks = jax.random.split(key, 6)

    B, dim, H, W = 2, 4, 16, 16
    dim_ins = (8, 16)
    dim_outs = (4, 8)

    x = jax.random.normal(ks[0], (B, dim, H, W), jnp.float32)
    fmaps = [
        jax.random.normal(ks[1], (B, dim_ins[0], 8, 8), jnp.float32),    # gets nearest-upsampled to 16x16
        jax.random.normal(ks[2], (B, dim_ins[1], 16, 16), jnp.float32),  # already at target size
    ]
    params = [init_block_params(k, ci, co)
              for k, ci, co in zip(ks[3:5], dim_ins, dim_outs)]

    y = upsample_combiner(x, fmaps, params, enabled=True)
    y = jax.block_until_ready(y)

    y_ref = upsample_combiner_reference(x, fmaps, params, enabled=True)
    assert y.shape == (B, dim + sum(dim_outs), H, W)
    assert jnp.allclose(y, y_ref, atol=1e-4, rtol=1e-4), "mismatch vs reference"

    # disabled / no-fmap path returns x unchanged
    y_disabled = upsample_combiner(x, fmaps, params, enabled=False)
    assert y_disabled is x

    print("KERNEL_OK")
</pallas_src>

<mosaic_0001>
module attributes {stable_mosaic.version = 11 : i64} {
  func.func @_block_kernel(%arg0: i32, %arg1: memref<1x8x256xf32, #tpu.memory_space<vmem>>, %arg2: memref<8x1xf32, #tpu.memory_space<vmem>>, %arg3: memref<8x1xf32, #tpu.memory_space<vmem>>, %arg4: memref<8x8xf32, #tpu.memory_space<vmem>>, %arg5: memref<9x4x8xf32, #tpu.memory_space<vmem>>, %arg6: memref<4x1xf32, #tpu.memory_space<vmem>>, %arg7: memref<9x256xf32, #tpu.memory_space<vmem>>, %arg8: memref<1x4x256xf32, #tpu.memory_space<vmem>>) attributes {dimension_semantics = [#tpu.dimension_semantics<parallel>], iteration_bounds = array<i64: 2>, scalar_prefetch = 0 : i64, scratch_operands = 0 : i64, tpu.core_type = #tpu.core_type<tc>, window_params = [{transform_indices = @transform_0, window_bounds = array<i64: 1, 8, 256>}, {pipeline_mode = #tpu.pipeline_mode<synchronous>, transform_indices = @transform_1, window_bounds = array<i64: 8, 1>}, {pipeline_mode = #tpu.pipeline_mode<synchronous>, transform_indices = @transform_2, window_bounds = array<i64: 8, 1>}, {pipeline_mode = #tpu.pipeline_mode<synchronous>, transform_indices = @transform_3, window_bounds = array<i64: 8, 8>}, {pipeline_mode = #tpu.pipeline_mode<synchronous>, transform_indices = @transform_4, window_bounds = array<i64: 9, 4, 8>}, {pipeline_mode = #tpu.pipeline_mode<synchronous>, transform_indices = @transform_5, window_bounds = array<i64: 4, 1>}, {pipeline_mode = #tpu.pipeline_mode<synchronous>, transform_indices = @transform_6, window_bounds = array<i64: 9, 256>}, {transform_indices = @transform_7, window_bounds = array<i64: 1, 4, 256>}]} {
    %c0 = arith.constant 0 : index
    %c0_0 = arith.constant 0 : index
    %c0_1 = arith.constant 0 : index
    %0 = vector.load %arg1[%c0, %c0_0, %c0_1] : memref<1x8x256xf32, #tpu.memory_space<vmem>>, vector<1x8x256xf32>
    %1 = vector.shape_cast %0 : vector<1x8x256xf32> to vector<8x256xf32>
    %cst = arith.constant dense<0.000000e+00> : vector<8xf32>
    %2 = vector.multi_reduction <add>, %1, %cst [1] : vector<8x256xf32> to vector<8xf32>
    %3 = vector.shape_cast %2 : vector<8xf32> to vector<8x1xf32>
    %4 = arith.mulf %1, %1 : vector<8x256xf32>
    %cst_2 = arith.constant dense<0.000000e+00> : vector<8xf32>
    %5 = vector.multi_reduction <add>, %4, %cst_2 [1] : vector<8x256xf32> to vector<8xf32>
    %6 = vector.shape_cast %5 : vector<8xf32> to vector<8x1xf32>
    %c0_3 = arith.constant 0 : index
    %c0_4 = arith.constant 0 : index
    %7 = vector.load %arg4[%c0_3, %c0_4] : memref<8x8xf32, #tpu.memory_space<vmem>>, vector<8x8xf32>
    %cst_5 = arith.constant dense<0.000000e+00> : vector<8x1xf32>
    %8 = tpu.matmul %7, %3, %cst_5 {dimension_numbers = #tpu.dot_dimension_numbers<[1], [0], [0], [1], [0, 0, 1, 1], [], []>} : vector<8x8xf32>, vector<8x1xf32>, vector<8x1xf32> -> vector<8x1xf32>
    %cst_6 = arith.constant dense<0.000000e+00> : vector<8x1xf32>
    %9 = tpu.matmul %7, %6, %cst_6 {dimension_numbers = #tpu.dot_dimension_numbers<[1], [0], [0], [1], [0, 0, 1, 1], [], []>} : vector<8x8xf32>, vector<8x1xf32>, vector<8x1xf32> -> vector<8x1xf32>
    %10 = arith.mulf %8, %8 : vector<8x1xf32>
    %11 = arith.subf %9, %10 : vector<8x1xf32>
    %12 = vector.broadcast %8 : vector<8x1xf32> to vector<8x256xf32>
    %13 = arith.subf %1, %12 : vector<8x256xf32>
    %cst_7 = arith.constant 9.99999974E-6 : f32
    %14 = vector.broadcast %cst_7 : f32 to vector<8x1xf32>
    %15 = arith.addf %11, %14 : vector<8x1xf32>
    %16 = math.rsqrt %15 : vector<8x1xf32>
    %17 = vector.broadcast %16 : vector<8x1xf32> to vector<8x256xf32>
    %18 = arith.mulf %13, %17 : vector<8x256xf32>
    %c0_8 = arith.constant 0 : index
    %c0_9 = arith.constant 0 : index
    %19 = vector.load %arg2[%c0_8, %c0_9] : memref<8x1xf32, #tpu.memory_space<vmem>>, vector<8x1xf32>
    %20 = vector.broadcast %19 : vector<8x1xf32> to vector<8x256xf32>
    %21 = arith.mulf %18, %20 : vector<8x256xf32>
    %c0_10 = arith.constant 0 : index
    %c0_11 = arith.constant 0 : index
    %22 = vector.load %arg3[%c0_10, %c0_11] : memref<8x1xf32, #tpu.memory_space<vmem>>, vector<8x1xf32>
    %23 = vector.broadcast %22 : vector<8x1xf32> to vector<8x256xf32>
    %24 = arith.addf %21, %23 : vector<8x256xf32>
    %25 = arith.negf %24 : vector<8x256xf32>
    %26 = math.exp %25 : vector<8x256xf32>
    %cst_12 = arith.constant 1.000000e+00 : f32
    %27 = vector.broadcast %cst_12 : f32 to vector<8x256xf32>
    %28 = arith.addf %27, %26 : vector<8x256xf32>
    %29 = arith.divf %27, %28 : vector<8x256xf32>
    %30 = arith.mulf %24, %29 : vector<8x256xf32>
    %c0_13 = arith.constant 0 : index
    %c0_14 = arith.constant 0 : index
    %31 = vector.load %arg7[%c0_13, %c0_14] : memref<9x256xf32, #tpu.memory_space<vmem>>, vector<9x256xf32>
    %cst_15 = arith.constant 0.000000e+00 : f32
    %32 = vector.broadcast %cst_15 : f32 to vector<4x256xf32>
    %c17_i32 = arith.constant 17 : i32
    %33 = tpu.dynamic_rotate %30 by %c17_i32 dim 1 : vector<8x256xf32>, i32 -> vector<8x256xf32>
    %c0_16 = arith.constant 0 : index
    %c0_17 = arith.constant 0 : index
    %c0_18 = arith.constant 0 : index
    %34 = vector.load %arg5[%c0_16, %c0_17, %c0_18] : memref<9x4x8xf32, #tpu.memory_space<vmem>>, vector<1x4x8xf32>
    %35 = vector.shape_cast %34 : vector<1x4x8xf32> to vector<4x8xf32>
    %cst_19 = arith.constant dense<0.000000e+00> : vector<4x256xf32>
    %36 = tpu.matmul %35, %33, %cst_19 {dimension_numbers = #tpu.dot_dimension_numbers<[1], [0], [0], [1], [0, 0, 1, 1], [], []>} : vector<4x8xf32>, vector<8x256xf32>, vector<4x256xf32> -> vector<4x256xf32>
    %37 = vector.extract_strided_slice %31 {offsets = [0, 0], sizes = [1, 256], strides = [1, 1]} : vector<9x256xf32> to vector<1x256xf32>
    %38 = vector.broadcast %37 : vector<1x256xf32> to vector<4x256xf32>
    %39 = arith.mulf %36, %38 : vector<4x256xf32>
    %40 = arith.addf %32, %39 : vector<4x256xf32>
    %c16_i32 = arith.constant 16 : i32
    %41 = tpu.dynamic_rotate %30 by %c16_i32 dim 1 : vector<8x256xf32>, i32 -> vector<8x256xf32>
    %c1 = arith.constant 1 : index
    %c0_20 = arith.constant 0 : index
    %c0_21 = arith.constant 0 : index
    %42 = vector.load %arg5[%c1, %c0_20, %c0_21] : memref<9x4x8xf32, #tpu.memory_space<vmem>>, vector<1x4x8xf32>
    %43 = vector.shape_cast %42 : vector<1x4x8xf32> to vector<4x8xf32>
    %cst_22 = arith.constant dense<0.000000e+00> : vector<4x256xf32>
    %44 = tpu.matmul %43, %41, %cst_22 {dimension_numbers = #tpu.dot_dimension_numbers<[1], [0], [0], [1], [0, 0, 1, 1], [], []>} : vector<4x8xf32>, vector<8x256xf32>, vector<4x256xf32> -> vector<4x256xf32>
    %45 = vector.extract_strided_slice %31 {offsets = [1, 0], sizes = [1, 256], strides = [1, 1]} : vector<9x256xf32> to vector<1x256xf32>
    %46 = vector.broadcast %45 : vector<1x256xf32> to vector<4x256xf32>
    %47 = arith.mulf %44, %46 : vector<4x256xf32>
    %48 = arith.addf %40, %47 : vector<4x256xf32>
    %c15_i32 = arith.constant 15 : i32
    %49 = tpu.dynamic_rotate %30 by %c15_i32 dim 1 : vector<8x256xf32>, i32 -> vector<8x256xf32>
    %c2 = arith.constant 2 : index
    %c0_23 = arith.constant 0 : index
    %c0_24 = arith.constant 0 : index
    %50 = vector.load %arg5[%c2, %c0_23, %c0_24] : memref<9x4x8xf32, #tpu.memory_space<vmem>>, vector<1x4x8xf32>
    %51 = vector.shape_cast %50 : vector<1x4x8xf32> to vector<4x8xf32>
    %cst_25 = arith.constant dense<0.000000e+00> : vector<4x256xf32>
    %52 = tpu.matmul %51, %49, %cst_25 {dimension_numbers = #tpu.dot_dimension_numbers<[1], [0], [0], [1], [0, 0, 1, 1], [], []>} : vector<4x8xf32>, vector<8x256xf32>, vector<4x256xf32> -> vector<4x256xf32>
    %53 = vector.extract_strided_slice %31 {offsets = [2, 0], sizes = [1, 256], strides = [1, 1]} : vector<9x256xf32> to vector<1x256xf32>
    %54 = vector.broadcast %53 : vector<1x256xf32> to vector<4x256xf32>
    %55 = arith.mulf %52, %54 : vector<4x256xf32>
    %56 = arith.addf %48, %55 : vector<4x256xf32>
    %c1_i32 = arith.constant 1 : i32
    %57 = tpu.dynamic_rotate %30 by %c1_i32 dim 1 : vector<8x256xf32>, i32 -> vector<8x256xf32>
    %c3 = arith.constant 3 : index
    %c0_26 = arith.constant 0 : index
    %c0_27 = arith.constant 0 : index
    %58 = vector.load %arg5[%c3, %c0_26, %c0_27] : memref<9x4x8xf32, #tpu.memory_space<vmem>>, vector<1x4x8xf32>
    %59 = vector.shape_cast %58 : vector<1x4x8xf32> to vector<4x8xf32>
    %cst_28 = arith.constant dense<0.000000e+00> : vector<4x256xf32>
    %60 = tpu.matmul %59, %57, %cst_28 {dimension_numbers = #tpu.dot_dimension_numbers<[1], [0], [0], [1], [0, 0, 1, 1], [], []>} : vector<4x8xf32>, vector<8x256xf32>, vector<4x256xf32> -> vector<4x256xf32>
    %61 = vector.extract_strided_slice %31 {offsets = [3, 0], sizes = [1, 256], strides = [1, 1]} : vector<9x256xf32> to vector<1x256xf32>
    %62 = vector.broadcast %61 : vector<1x256xf32> to vector<4x256xf32>
    %63 = arith.mulf %60, %62 : vector<4x256xf32>
    %64 = arith.addf %56, %63 : vector<4x256xf32>
    %c4 = arith.constant 4 : index
    %c0_29 = arith.constant 0 : index
    %c0_30 = arith.constant 0 : index
    %65 = vector.load %arg5[%c4, %c0_29, %c0_30] : memref<9x4x8xf32, #tpu.memory_space<vmem>>, vector<1x4x8xf32>
    %66 = vector.shape_cast %65 : vector<1x4x8xf32> to vector<4x8xf32>
    %cst_31 = arith.constant dense<0.000000e+00> : vector<4x256xf32>
    %67 = tpu.matmul %66, %30, %cst_31 {dimension_numbers = #tpu.dot_dimension_numbers<[1], [0], [0], [1], [0, 0, 1, 1], [], []>} : vector<4x8xf32>, vector<8x256xf32>, vector<4x256xf32> -> vector<4x256xf32>
    %68 = vector.extract_strided_slice %31 {offsets = [4, 0], sizes = [1, 256], strides = [1, 1]} : vector<9x256xf32> to vector<1x256xf32>
    %69 = vector.broadcast %68 : vector<1x256xf32> to vector<4x256xf32>
    %70 = arith.mulf %67, %69 : vector<4x256xf32>
    %71 = arith.addf %64, %70 : vector<4x256xf32>
    %c255_i32 = arith.constant 255 : i32
    %72 = tpu.dynamic_rotate %30 by %c255_i32 dim 1 : vector<8x256xf32>, i32 -> vector<8x256xf32>
    %c5 = arith.constant 5 : index
    %c0_32 = arith.constant 0 : index
    %c0_33 = arith.constant 0 : index
    %73 = vector.load %arg5[%c5, %c0_32, %c0_33] : memref<9x4x8xf32, #tpu.memory_space<vmem>>, vector<1x4x8xf32>
    %74 = vector.shape_cast %73 : vector<1x4x8xf32> to vector<4x8xf32>
    %cst_34 = arith.constant dense<0.000000e+00> : vector<4x256xf32>
    %75 = tpu.matmul %74, %72, %cst_34 {dimension_numbers = #tpu.dot_dimension_numbers<[1], [0], [0], [1], [0, 0, 1, 1], [], []>} : vector<4x8xf32>, vector<8x256xf32>, vector<4x256xf32> -> vector<4x256xf32>
    %76 = vector.extract_strided_slice %31 {offsets = [5, 0], sizes = [1, 256], strides = [1, 1]} : vector<9x256xf32> to vector<1x256xf32>
    %77 = vector.broadcast %76 : vector<1x256xf32> to vector<4x256xf32>
    %78 = arith.mulf %75, %77 : vector<4x256xf32>
    %79 = arith.addf %71, %78 : vector<4x256xf32>
    %c241_i32 = arith.constant 241 : i32
    %80 = tpu.dynamic_rotate %30 by %c241_i32 dim 1 : vector<8x256xf32>, i32 -> vector<8x256xf32>
    %c6 = arith.constant 6 : index
    %c0_35 = arith.constant 0 : index
    %c0_36 = arith.constant 0 : index
    %81 = vector.load %arg5[%c6, %c0_35, %c0_36] : memref<9x4x8xf32, #tpu.memory_space<vmem>>, vector<1x4x8xf32>
    %82 = vector.shape_cast %81 : vector<1x4x8xf32> to vector<4x8xf32>
    %cst_37 = arith.constant dense<0.000000e+00> : vector<4x256xf32>
    %83 = tpu.matmul %82, %80, %cst_37 {dimension_numbers = #tpu.dot_dimension_numbers<[1], [0], [0], [1], [0, 0, 1, 1], [], []>} : vector<4x8xf32>, vector<8x256xf32>, vector<4x256xf32> -> vector<4x256xf32>
    %84 = vector.extract_strided_slice %31 {offsets = [6, 0], sizes = [1, 256], strides = [1, 1]} : vector<9x256xf32> to vector<1x256xf32>
    %85 = vector.broadcast %84 : vector<1x256xf32> to vector<4x256xf32>
    %86 = arith.mulf %83, %85 : vector<4x256xf32>
    %87 = arith.addf %79, %86 : vector<4x256xf32>
    %c240_i32 = arith.constant 240 : i32
    %88 = tpu.dynamic_rotate %30 by %c240_i32 dim 1 : vector<8x256xf32>, i32 -> vector<8x256xf32>
    %c7 = arith.constant 7 : index
    %c0_38 = arith.constant 0 : index
    %c0_39 = arith.constant 0 : index
    %89 = vector.load %arg5[%c7, %c0_38, %c0_39] : memref<9x4x8xf32, #tpu.memory_space<vmem>>, vector<1x4x8xf32>
    %90 = vector.shape_cast %89 : vector<1x4x8xf32> to vector<4x8xf32>
    %cst_40 = arith.constant dense<0.000000e+00> : vector<4x256xf32>
    %91 = tpu.matmul %90, %88, %cst_40 {dimension_numbers = #tpu.dot_dimension_numbers<[1], [0], [0], [1], [0, 0, 1, 1], [], []>} : vector<4x8xf32>, vector<8x256xf32>, vector<4x256xf32> -> vector<4x256xf32>
    %92 = vector.extract_strided_slice %31 {offsets = [7, 0], sizes = [1, 256], strides = [1, 1]} : vector<9x256xf32> to vector<1x256xf32>
    %93 = vector.broadcast %92 : vector<1x256xf32> to vector<4x256xf32>
    %94 = arith.mulf %91, %93 : vector<4x256xf32>
    %95 = arith.addf %87, %94 : vector<4x256xf32>
    %c239_i32 = arith.constant 239 : i32
    %96 = tpu.dynamic_rotate %30 by %c239_i32 dim 1 : vector<8x256xf32>, i32 -> vector<8x256xf32>
    %c8 = arith.constant 8 : index
    %c0_41 = arith.constant 0 : index
    %c0_42 = arith.constant 0 : index
    %97 = vector.load %arg5[%c8, %c0_41, %c0_42] : memref<9x4x8xf32, #tpu.memory_space<vmem>>, vector<1x4x8xf32>
    %98 = vector.shape_cast %97 : vector<1x4x8xf32> to vector<4x8xf32>
    %cst_43 = arith.constant dense<0.000000e+00> : vector<4x256xf32>
    %99 = tpu.matmul %98, %96, %cst_43 {dimension_numbers = #tpu.dot_dimension_numbers<[1], [0], [0], [1], [0, 0, 1, 1], [], []>} : vector<4x8xf32>, vector<8x256xf32>, vector<4x256xf32> -> vector<4x256xf32>
    %100 = vector.extract_strided_slice %31 {offsets = [8, 0], sizes = [1, 256], strides = [1, 1]} : vector<9x256xf32> to vector<1x256xf32>
    %101 = vector.broadcast %100 : vector<1x256xf32> to vector<4x256xf32>
    %102 = arith.mulf %99, %101 : vector<4x256xf32>
    %103 = arith.addf %95, %102 : vector<4x256xf32>
    %c0_44 = arith.constant 0 : index
    %c0_45 = arith.constant 0 : index
    %104 = vector.load %arg6[%c0_44, %c0_45] : memref<4x1xf32, #tpu.memory_space<vmem>>, vector<4x1xf32>
    %105 = vector.broadcast %104 : vector<4x1xf32> to vector<4x256xf32>
    %106 = arith.addf %103, %105 : vector<4x256xf32>
    %c0_46 = arith.constant 0 : index
    %c0_47 = arith.constant 0 : index
    %c0_48 = arith.constant 0 : index
    %107 = vector.load %arg8[%c0_46, %c0_47, %c0_48] : memref<1x4x256xf32, #tpu.memory_space<vmem>>, vector<1x4x256xf32>
    %108 = vector.shape_cast %107 : vector<1x4x256xf32> to vector<4x256xf32>
    %109 = vector.shape_cast %106 : vector<4x256xf32> to vector<1x4x256xf32>
    tpu.vector_store %arg8[%c0_46, %c0_47, %c0_48], %109 {strides = array<i32>} : memref<1x4x256xf32, #tpu.memory_space<vmem>>, vector<1x4x256xf32>,
    return
  }
  func.func @transform_0(%arg0: i32) -> (i32, i32, i32) {
    %c0_i32 = arith.constant 0 : i32
    %c0_i32_0 = arith.constant 0 : i32
    %c0_i32_1 = arith.constant 0 : i32
    return %arg0, %c0_i32, %c0_i32_0 : i32, i32, i32
  }
  func.func @transform_1(%arg0: i32) -> (i32, i32) {
    %c0_i32 = arith.constant 0 : i32
    %c0_i32_0 = arith.constant 0 : i32
    %c0_i32_1 = arith.constant 0 : i32
    return %c0_i32, %c0_i32_0 : i32, i32
  }
  func.func @transform_2(%arg0: i32) -> (i32, i32) {
    %c0_i32 = arith.constant 0 : i32
    %c0_i32_0 = arith.constant 0 : i32
    %c0_i32_1 = arith.constant 0 : i32
    return %c0_i32, %c0_i32_0 : i32, i32
  }
  func.func @transform_3(%arg0: i32) -> (i32, i32) {
    %c0_i32 = arith.constant 0 : i32
    %c0_i32_0 = arith.constant 0 : i32
    %c0_i32_1 = arith.constant 0 : i32
    return %c0_i32, %c0_i32_0 : i32, i32
  }
  func.func @transform_4(%arg0: i32) -> (i32, i32, i32) {
    %c0_i32 = arith.constant 0 : i32
    %c0_i32_0 = arith.constant 0 : i32
    %c0_i32_1 = arith.constant 0 : i32
    %c0_i32_2 = arith.constant 0 : i32
    return %c0_i32, %c0_i32_0, %c0_i32_1 : i32, i32, i32
  }
  func.func @transform_5(%arg0: i32) -> (i32, i32) {
    %c0_i32 = arith.constant 0 : i32
    %c0_i32_0 = arith.constant 0 : i32
    %c0_i32_1 = arith.constant 0 : i32
    return %c0_i32, %c0_i32_0 : i32, i32
  }
  func.func @transform_6(%arg0: i32) -> (i32, i32) {
    %c0_i32 = arith.constant 0 : i32
    %c0_i32_0 = arith.constant 0 : i32
    %c0_i32_1 = arith.constant 0 : i32
    return %c0_i32, %c0_i32_0 : i32, i32
  }
  func.func @transform_7(%arg0: i32) -> (i32, i32, i32) {
    %c0_i32 = arith.constant 0 : i32
    %c0_i32_0 = arith.constant 0 : i32
    %c0_i32_1 = arith.constant 0 : i32
    return %arg0, %c0_i32, %c0_i32_0 : i32, i32, i32
  }
}

</mosaic_0001>

<bundles_post_ra>
// kernel: tpu_custom_call.1
= control target key start
LH: loop header
LB: loop body
LE: loop exit
PB: predicated region body
PF: predicated region fallthrough
CT: control target
= control target key end

     0   :  { %12 = vsyncpa [#allocation3], 0  ;;  %s1456_s0 = inlined_call_operand.vmem [shape: f32[2,8,256], index: 0, kind: input, shape index: {}]   ;;  %s1457_s1 = inlined_call_operand.vmem [shape: f32[8,1], index: 1, kind: input, shape index: {}]   ;;  %s1458_s2 = inlined_call_operand.vmem [shape: f32[8,1], index: 2, kind: input, shape index: {}]   ;;  %s1459_s3 = inlined_call_operand.vmem [shape: f32[8,8], index: 3, kind: input, shape index: {}]   ;;  %s1460_s4 = inlined_call_operand.vmem [shape: f32[9,4,8], index: 4, kind: input, shape index: {}]   ;;  %s1461_s5 = inlined_call_operand.vmem [shape: f32[4,1], index: 5, kind: input, shape index: {}]   ;;  %s1462_s6 = inlined_call_operand.vmem [shape: f32[9,256], index: 6, kind: input, shape index: {}]   ;;  %s1463_s7 = inlined_call_operand.hbm [shape: f32[2,4,256], index: 7, kind: output, shape index: {}]  }
   0x1   :  { %14 = vsyncpa [#allocation3 + $0x1], 0  ;;  %s1286_s24 = smov 0   ;;  %s1288_s25 = smov 0  }
   0x2   :  { %s1290_s26 = smov 0   ;;  %s1292_s27 = smov 0  }
   0x3 LB: > { %s1307_s28 = sadd.s32 4294967295, %s1235_s27   ;;  %s1026_s29 = sadd.s32 4294967294, %s1235_s27   ;;  %s1235_s27 = sphi %s1292_s27, %s1469_s27   ;;  %s1231_s26 = sphi %s1290_s26, %s1468_s26   ;;  %s1227_s25 = sphi %s1288_s25, %s1467_s25   ;;  %s1223_s24 = sphi %s1286_s24, %s1466_s24  }
   0x4   : > { %s1311_s30 = sadd.s32 1, %s1235_s27   ;;  %s179_s8 = sadd.s32 1, %s1231_s26 }
   0x5   : > { %s176_s9 = ssub.s32 %s1235_s27, %s1311_s30  ;;  %p189_p0 = scmp.ne.s32.totalorder %s1231_s26, %s1227_s25 }
   0x6   : > { %p177_p1 = scmp.eq.s32.totalorder %s176_s9, 0  ;;  %p190_p2 = scmp.eq.s32.totalorder %s1307_s28, 1 }
   0x7   : > { %p195_p3 = scmp.ne.s32.totalorder %s1227_s25, %s1223_s24  ;;  %p196_p4 = scmp.eq.s32.totalorder %s1026_s29, 1 }
   0x8   : > { %s1322_s10 = scalar_select %p177_p1, %s1231_s26, %s179_s8  }
   0x9   : > { %p1324_p5 = por %p190_p2, %p189_p0  ;;  %p1328_p6 = por %p196_p4, %p195_p3 }
   0xa   : > { %p1029_p7 = scmp.ge.s32.totalorder %s1235_s27, 1  ;;  %p240_p8 = scmp.lt.s32.totalorder %s1235_s27, 3 }
   0xc   : > { %p241_p9 = pnand %p1029_p7, %p240_p8 }
   0xd   : > { %p272_p10 = scmp.lt.s32.totalorder (!%p241_p9), %s1307_s28, 1  ;;  %s1238_s29 = smov (!%p241_p9), 16  }
   0xe   : > { %244 = sbr.rel (%p241_p9) target bundleno = 750 (0x2ee), region = 48  ;;  %s1239_s8 = smov (!%p241_p9), 15  }
   0xf   : > { %s1240_s9 = smov (!%p241_p9), 17   ;;  %s1243_s15 = smov (!%p241_p9), 112  }
  0x10   : > { %s1244_s16 = smov (!%p241_p9), 111   ;;  %s1069_s20 = sshll.u32 (!%p241_p9), %s1307_s28, 3 }
  0x11   : > { %s962_s23 = scalar_lea.hbm (!%p241_p9), %s1463_s7, %s1069_s20  ;;  %s1193_s18 = scalar_lea.hbm (!%p241_p9), %s1463_s7, 16 }
  0x13   : > { %s273_s13 = scalar_select %p272_p10, %s1307_s28, 1  ;;  %v1237_v6 = vmov 0   ;;  %v287_v7 = vld [vmem:[%s1459_s3] sm:$0xff]  ;;  %vm288_vm0 = vcmask 64512  }
  0x14   : > { %1118 = vset.pattern.permute.xlu1 %v1237_v6  ;;  %1119 = vset.pattern.permute.xlu2 %v1237_v6  ;;  %v359_v10 = vld [vmem:[%s1457_s1] sm:$0xff] }
  0x15   : > { %s1068_s14 = sshll.u32 %s273_s13, 4  ;;  %1160 = vset.pattern.permute.xlu0 %v1237_v6  ;;  %362 = vperm.xlu2 %1119, %v359_v10   ;;  %v367_v13 = vld [vmem:[%s1458_s2] sm:$0xff]  ;;  %s1241_s13 = smov 113  }
  0x16   : > { %s276_s17 = scalar_lea.vmem %s1456_s0, %s1068_s14  ;;  %s1242_s14 = smov 1  }
  0x17   : > { %v277_v0 = vld [vmem:[%s276_s17] sm:$0xff]  ;;  %v278_v1 = vld [vmem:[%s276_s17 + $0x8] sm:$0xff]  ;;  %s1245_s17 = smov 127  }
  0x18   : > { %v279_v2 = vadd.f32 %v278_v1, %v277_v0  ;;  %v282_v3 = vmul.f32 %v277_v0, %v277_v0  ;;  %v283_v4 = vmul.f32 %v278_v1, %v278_v1 }
  0x1a   : > { %280 = vadd.xlane.f32.xlu0 %v279_v2  ;;  %v284_v5 = vadd.f32 %v283_v4, %v282_v3  ;;  %v423_v2 = vlaneseq }
  0x1c   : > { %v1353_v3 = vand.u32 127, %v423_v2 }
  0x1d   : > { %370 = vperm.xlu2 %1119, %v367_v13  }
  0x1e   : > { %vm482_vm12 = vcmp.lt.s32.totalorder %v1353_v3, 16  ;;  %vm425_vm13 = vcmp.lt.s32.totalorder %v1353_v3, 17  ;;  %vm540_vm14 = vcmp.lt.s32.totalorder %v1353_v3, 15  ;;  %vm598_vm15 = vcmp.lt.s32.totalorder %v1353_v3, 1 }
  0x22   : > { %285 = vadd.xlane.f32.xlu0 %v284_v5 }
  0x6f   : > { %v363_v25 = vpop.permute.xlu2 %362 }
  0x77   : > { %v371_v33 = vpop.permute.xlu2 %370 }
  0x8d   : > { %v281_v8 = vpop.xlane.xlu0 %280 }
  0x8e   : > { %307 = vmatpush.msra.mxu0 %v281_v8 }
  0x8f   : > { %1033 = vmatmul.msk.f32.vlgmr.msra.gmra.mxu0 %vm288_vm0, %v287_v7 }
  0x95   : > { %v286_v9 = vpop.xlane.xlu0 %285 }
  0x96   : > { %327 = vmatpush.msra.mxu1 %v286_v9 }
  0x97   : > { %1034 = vmatmul.msk.f32.vlgmr.msra.gmra.mxu1 %vm288_vm0, %v287_v7  ;;  %v1039_v7 = vld [vmem:[%s1460_s4 + $0x4] sm:$0xf] }
 0x10c   : > { %v309_v11 = vpop.f32.mrf.mxu0 }
 0x10d   : > { %336 = vperm.xlu1 %1118, %v309_v11   ;;  %v332_v12 = vmul.f32 %v309_v11, %v309_v11 }
 0x114   : > { %v329_v14 = vpop.f32.mrf.mxu1 }
 0x115   : > { %v333_v15 = vsub.f32 %v329_v14, %v332_v12 }
 0x117   : > { %v341_v16 = vadd.f32 1e-05, %v333_v15 }
 0x119   : > { %1163 = vrsqrt.f32 %v341_v16  ;;  %vm348_vm2 = vweird.f32 %v341_v16 }
 0x11f   : > { %v1164_v17 = vpop.eup %1163 }
 0x120   : > { %v343_v18 = vmul.f32 %v1164_v17, %v341_v16  ;;  %vm349_vm1 = vweird.f32 %v1164_v17  ;;  %v428_v16 = vld [vmem:[%s1460_s4] sm:$0xf] }
 0x121   : > { %vm350_vm3 = vmor %vm348_vm2, %vm349_vm1  ;;  %vm765_vm1 = vcmp.lt.s32.totalorder %v1353_v3, 113  ;;  %vm707_vm2 = vcmp.lt.s32.totalorder %v1353_v3, 127 }
 0x122   : > { %v344_v19 = vmul.f32 %v1164_v17, %v343_v18 }
 0x124   : > { %v345_v20 = vmul.f32 0.5, %v344_v19 }
 0x126   : > { %v346_v21 = vsub.f32 1.5, %v345_v20 }
 0x128   : > { %v347_v22 = vmul.f32 %v1164_v17, %v346_v21 }
 0x12a   : > { %v351_v23 = vsel %vm350_vm3, %v1164_v17, %v347_v22  ;;  %vm823_vm3 = vcmp.lt.s32.totalorder %v1353_v3, 112 }
 0x12b   : > { %354 = vperm.xlu1 %1118, %v351_v23  }
 0x17f   : > { %v337_v24 = vpop.permute.xlu1 %336 }
 0x180   : > { %v339_v26 = vsub.f32 %v277_v0, %v337_v24  ;;  %v340_v27 = vsub.f32 %v278_v1, %v337_v24  ;;  %v935_v1 = vld [vmem:[%s1461_s5] sm:$0xf] }
 0x19d   : > { %v355_v28 = vpop.permute.xlu1 %354 }
 0x19e   : > { %v357_v29 = vmul.f32 %v355_v28, %v339_v26  ;;  %v358_v30 = vmul.f32 %v355_v28, %v340_v27  ;;  %v1045_v27 = vld [vmem:[%s1460_s4 + $0xc] sm:$0xf] }
 0x1a0   : > { %v365_v31 = vmul.f32 %v363_v25, %v357_v29  ;;  %v366_v32 = vmul.f32 %v363_v25, %v358_v30  ;;  %v1042_v30 = vld [vmem:[%s1460_s4 + $0x8] sm:$0xf] }
 0x1a2   : > { %v373_v34 = vadd.f32 %v371_v33, %v365_v31  ;;  %v374_v35 = vadd.f32 %v371_v33, %v366_v32 }
 0x1a4   : > { %v1035_v36 = vmul.f32 -1.442695, %v373_v34  ;;  %v1036_v37 = vmul.f32 -1.442695, %v374_v35 }
 0x1a6   : > { %1165 = vpow2.f32 %v1035_v36 }
 0x1a7   : > { %1167 = vpow2.f32 %v1036_v37 }
 0x1ac   : > { %v1166_v38 = vpop.eup %1165 }
 0x1ad   : > { %v1168_v39 = vpop.eup %1167  ;;  %v381_v40 = vadd.f32 1.0, %v1166_v38 }
 0x1ae   : > { %v382_v41 = vadd.f32 1.0, %v1168_v39 }
 0x1af   : > { %1169 = vrcp.f32 %v381_v40  ;;  %v394_v47 = vand.u32 2147483648, %v381_v40  ;;  %v392_v50 = vand.u32 2147483647, %v381_v40  ;;  %vm388_vm6 = vweird.f32 %v381_v40 }
 0x1b0   : > { %1171 = vrcp.f32 %v382_v41  ;;  %v409_v51 = vand.u32 2147483648, %v382_v41  ;;  %v407_v53 = vand.u32 2147483647, %v382_v41  ;;  %vm403_vm8 = vweird.f32 %v382_v41 }
 0x1b1   : > { %v395_v55 = vor.u32 1.1754944e-38, %v394_v47  ;;  %vm393_vm9 = vcmp.eq.f32.partialorder %v392_v50, 8.507059e+37  ;;  %v1051_v47 = vld [vmem:[%s1460_s4 + $0x14] sm:$0xf]  ;;  %v1054_v50 = vld [vmem:[%s1460_s4 + $0x18] sm:$0xf] }
 0x1b2   : > { %v410_v58 = vor.u32 1.1754944e-38, %v409_v51  ;;  %vm408_vm11 = vcmp.eq.f32.partialorder %v407_v53, 8.507059e+37  ;;  %v1057_v51 = vld [vmem:[%s1460_s4 + $0x1c] sm:$0xf] }
 0x1b5   : > { %v1170_v42 = vpop.eup %1169 }
 0x1b6   : > { %v1172_v43 = vpop.eup %1171  ;;  %v384_v44 = vmul.f32 %v1170_v42, %v381_v40  ;;  %vm389_vm4 = vweird.f32 %v1170_v42 }
 0x1b7   : > { %v399_v45 = vmul.f32 %v1172_v43, %v382_v41  ;;  %vm404_vm5 = vweird.f32 %v1172_v43  ;;  %vm390_vm7 = vmor %vm388_vm6, %vm389_vm4  ;;  %vm881_vm4 = vcmp.lt.s32.totalorder %v1353_v3, 111 }
 0x1b8   : > { %v385_v46 = vsub.f32 1.0, %v384_v44  ;;  %vm405_vm10 = vmor %vm403_vm8, %vm404_vm5  ;;  %v1048_v44 = vld [vmem:[%s1460_s4 + $0x10] sm:$0xf] }
 0x1b9   : > { %v400_v48 = vsub.f32 1.0, %v399_v45 }
 0x1ba   : > { %v386_v49 = vmul.f32 %v1170_v42, %v385_v46 }
 0x1bb   : > { %v401_v52 = vmul.f32 %v1172_v43, %v400_v48 }
 0x1bc   : > { %v387_v54 = vadd.f32 %v1170_v42, %v386_v49 }
 0x1bd   : > { %v402_v56 = vadd.f32 %v1172_v43, %v401_v52  ;;  %v1060_v52 = vld [vmem:[%s1460_s4 + $0x20] sm:$0xf] }
 0x1be   : > { %v391_v57 = vsel %vm390_vm7, %v1170_v42, %v387_v54 }
 0x1bf   : > { %v396_v59 = vsel %vm393_vm9, %v395_v55, %v391_v57  ;;  %v406_v60 = vsel %vm405_vm10, %v1172_v43, %v402_v56  ;;  %v415_v57 = vld [vmem:[%s1462_s6] sm:$0xff] }
 0x1c0   : > { %v411_v61 = vsel %vm408_vm11, %v410_v58, %v406_v60  ;;  %v413_v62 = vmul.f32 %v396_v59, %v373_v34  ;;  %v416_v58 = vld [vmem:[%s1462_s6 + $0x8] sm:$0xff]  ;;  %v588_v3 = vperm.slane %v415_v57, 2 }
 0x1c1   : > { %v414_v63 = vmul.f32 %v411_v61, %v374_v35  ;;  %v472_v61 = vperm.slane %v415_v57, 0 }
 0x1c3   : > { %v1130_v0 = vpack.i.bf16 %v414_v63, %v413_v62 }
 0x1c5   : > { %1131 = vrot.lane.b32.xlu2 %v1130_v0, %s1238_s29  ;;  %1126 = vrot.lane.b32.xlu1 %v1130_v0, %s1239_s8 }
 0x1c6   : > { %1121 = vrot.lane.b32.xlu0 %v1130_v0, %s1240_s9  ;;  %s966_s9 = sshll.u32 %s962_s23, 4  ;;  %s967_s9 = int_to_ptr.hbm [resolvable:$true] %s966_s9 }
 0x1cd   : > { %1141 = vrot.lane.b32.xlu2 %v1130_v0, %s1241_s13  ;;  %1136 = vrot.lane.b32.xlu1 %v1130_v0, %s1242_s14  ;;  %s269_s14 = sand.u32 1, %s1227_s25   ;;  %s1187_s13 = sshra.s32 %s967_s9, 4  ;;  %s1188_s13 = int_to_ptr.hbm [resolvable:$true] %s1187_s13 }
 0x1ce   : > { %1156 = vrot.lane.b32.xlu0 %v1130_v0, %s1243_s15  ;;  %s1030_s19 = sshll.u32 %s269_s14, 3  ;;  %s951_s28 = scalar_lea.sflag [#allocation3], %s269_s14 }
 0x1cf   : > { %s271_s29 = scalar_lea.vmem [#allocation2], %s1030_s19  ;;  %s1189_s15 = scalar_lea.hbm %s1188_s13, 8 }
 0x1d0   : > { %s964_s8 = sshll.u32 %s271_s29, 4  ;;  %p1190_p11 = scmp.ne.s32.totalorder %s1188_s13, %s1189_s15  ;;  %s965_s8 = int_to_ptr.vmem [resolvable:$true] %s964_s8 }
 0x1d1   : > { %p1194_p0 = scmp.lt.s32.totalorder %s1188_s13, %s1463_s7  ;;  %p1195_p1 = scmp.lt.s32.totalorder %s1193_s18, %s1189_s15 }
 0x1d2   : > { %p1191_p12 = pnand %p1190_p11, %p1324_p5 }
 0x1d3   : > { %p1196_p2 = por %p1195_p1, %p1194_p0 }
 0x1d4   : > { %p1192_p13 = pneg %p1191_p12 }
 0x1d5   : > { %1151 = vrot.lane.b32.xlu2 %v1130_v0, %s1244_s16  ;;  %1146 = vrot.lane.b32.xlu1 %v1130_v0, %s1245_s17  ;;  %v530_v0 = vperm.slane %v415_v57, 1 }
 0x1d6   : > { %p1197_p3 = pnand %p1196_p2, %p1192_p13 }
 0x1dd   : > { %938 = vperm.xlu1 %1118, %v935_v1  }
 0x21f   : > { %v1132_v4 = vpop.permute.xlu2 %1131 }
 0x220   : > { %v1134_v5 = vunpack.i.h.bf16 %v1132_v4  ;;  %v1133_v6 = vunpack.i.l.bf16 %v1132_v4  ;;  %v589_v4 = vperm.slane %v416_v58, 2 }
 0x222   : > { %v484_v8 = vsel %vm482_vm12, %v1134_v5, %v1133_v6  ;;  %v483_v9 = vsel %vm482_vm12, %v1133_v6, %v1134_v5 }
 0x223   : > { %505 = vmatpush.msrb.mxu0 %v484_v8  ;;  %525 = vmatpush.msrb.mxu1 %v483_v9 }
 0x224   : > { %1041 = vmatmul.msk.f32.vlgmr.msrb.gmra.mxu1 %vm288_vm0, %v1039_v7  ;;  %1040 = vmatmul.msk.f32.vlgmr.msrb.gmra.mxu0 %vm288_vm0, %v1039_v7 }
 0x227   : > { %v1142_v21 = vpop.permute.xlu2 %1141 }
 0x228   : > { %v1144_v25 = vunpack.i.h.bf16 %v1142_v21  ;;  %v1143_v26 = vunpack.i.l.bf16 %v1142_v21 }
 0x22a   : > { %v766_v32 = vsel %vm765_vm1, %v1143_v26, %v1144_v25  ;;  %v767_v33 = vsel %vm765_vm1, %v1144_v25, %v1143_v26 }
 0x22f   : > { %v1152_v34 = vpop.permute.xlu2 %1151 }
 0x230   : > { %v1154_v40 = vunpack.i.h.bf16 %v1152_v34  ;;  %v1153_v41 = vunpack.i.l.bf16 %v1152_v34 }
 0x232   : > { %v882_v48 = vsel %vm881_vm4, %v1153_v41, %v1154_v40  ;;  %v883_v49 = vsel %vm881_vm4, %v1154_v40, %v1153_v41  ;;  %v871_v41 = vperm.slane %v415_v57, 7 }
 0x237   : > { %v1127_v10 = vpop.permute.xlu1 %1126 }
 0x238   : > { %v1129_v11 = vunpack.i.h.bf16 %v1127_v10  ;;  %v1128_v12 = vunpack.i.l.bf16 %v1127_v10  ;;  %v1122_v13 = vpop.permute.xlu0 %1121 }
 0x239   : > { %v1124_v14 = vunpack.i.h.bf16 %v1122_v13  ;;  %v1123_v15 = vunpack.i.l.bf16 %v1122_v13 }
 0x23a   : > { %v542_v19 = vsel %vm540_vm14, %v1129_v11, %v1128_v12  ;;  %v541_v20 = vsel %vm540_vm14, %v1128_v12, %v1129_v11  ;;  %v646_v11 = vperm.slane %v415_v57, 3  ;;  %v647_v12 = vperm.slane %v416_v58, 3 }
 0x23b   : > { %v427_v17 = vsel %vm425_vm13, %v1124_v14, %v1123_v15  ;;  %v426_v18 = vsel %vm425_vm13, %v1123_v15, %v1124_v14  ;;  %v697_v15 = vperm.slane %v415_v57, 4 }
 0x23c   : > { %447 = vmatpush.msra.mxu2 %v427_v17  ;;  %467 = vmatpush.msra.mxu3 %v426_v18 }
 0x23d   : > { %1037 = vmatmul.msk.f32.vlgmr.msra.gmra.mxu2 %vm288_vm0, %v428_v16  ;;  %1038 = vmatmul.msk.f32.vlgmr.msra.gmra.mxu3 %vm288_vm0, %v428_v16  ;;  %v698_v16 = vperm.slane %v416_v58, 4 }
 0x23e   : > { %563 = vmatpush.msrb.mxu2 %v542_v19  ;;  %583 = vmatpush.msrb.mxu3 %v541_v20 }
 0x23f   : > { %v1137_v22 = vpop.permute.xlu1 %1136 }
 0x240   : > { %672 = vmatpush.msra.mxu2 %v413_v62  ;;  %692 = vmatpush.msra.mxu3 %v414_v63  ;;  %v1139_v23 = vunpack.i.h.bf16 %v1137_v22  ;;  %v1138_v24 = vunpack.i.l.bf16 %v1137_v22  ;;  %v1157_v31 = vpop.permute.xlu0 %1156  ;;  %v473_v62 = vperm.slane %v416_v58, 0  ;;  %v531_v63 = vperm.slane %v416_v58, 1 }
 0x241   : > { %v1159_v35 = vunpack.i.h.bf16 %v1157_v31  ;;  %v1158_v36 = vunpack.i.l.bf16 %v1157_v31  ;;  %v813_v31 = vperm.slane %v415_v57, 6 }
 0x242   : > { %v600_v28 = vsel %vm598_vm15, %v1139_v23, %v1138_v24  ;;  %v599_v29 = vsel %vm598_vm15, %v1138_v24, %v1139_v23 }
 0x243   : > { %621 = vmatpush.msra.mxu0 %v600_v28  ;;  %641 = vmatpush.msra.mxu1 %v599_v29  ;;  %v824_v45 = vsel %vm823_vm3, %v1158_v36, %v1159_v35  ;;  %v825_v46 = vsel %vm823_vm3, %v1159_v35, %v1158_v36  ;;  %v756_v28 = vperm.slane %v416_v58, 5 }
 0x244   : > { %1046 = vmatmul.msk.f32.vlgmr.msra.gmra.mxu0 %vm288_vm0, %v1045_v27  ;;  %1047 = vmatmul.msk.f32.vlgmr.msra.gmra.mxu1 %vm288_vm0, %v1045_v27  ;;  %v755_v27 = vperm.slane %v415_v57, 5 }
 0x245   : > { %1043 = vmatmul.msk.f32.vlgmr.msrb.gmra.mxu2 %vm288_vm0, %v1042_v30  ;;  %1044 = vmatmul.msk.f32.vlgmr.msrb.gmra.mxu3 %vm288_vm0, %v1042_v30 }
 0x246   : > { %788 = vmatpush.msrb.mxu2 %v766_v32  ;;  %808 = vmatpush.msrb.mxu3 %v767_v33  ;;  %v814_v32 = vperm.slane %v416_v58, 6 }
 0x247   : > { %v1147_v37 = vpop.permute.xlu1 %1146 }
 0x248   : > { %v1149_v38 = vunpack.i.h.bf16 %v1147_v37  ;;  %v1148_v39 = vunpack.i.l.bf16 %v1147_v37 }
 0x24a   : > { %v708_v42 = vsel %vm707_vm2, %v1148_v39, %v1149_v38  ;;  %v709_v43 = vsel %vm707_vm2, %v1149_v38, %v1148_v39 }
 0x24b   : > { %730 = vmatpush.msrb.mxu0 %v708_v42  ;;  %750 = vmatpush.msrb.mxu1 %v709_v43  ;;  %v872_v42 = vperm.slane %v416_v58, 7 }
 0x24c   : > { %1052 = vmatmul.msk.f32.vlgmr.msrb.gmra.mxu0 %vm288_vm0, %v1051_v47  ;;  %1053 = vmatmul.msk.f32.vlgmr.msrb.gmra.mxu1 %vm288_vm0, %v1051_v47 }
 0x24d   : > { %846 = vmatpush.msra.mxu0 %v824_v45  ;;  %866 = vmatpush.msra.mxu1 %v825_v46 }
 0x24e   : > { %1049 = vmatmul.msk.f32.vlgmr.msra.gmra.mxu2 %vm288_vm0, %v1048_v44  ;;  %1050 = vmatmul.msk.f32.vlgmr.msra.gmra.mxu3 %vm288_vm0, %v1048_v44 }
 0x24f   : > { %904 = vmatpush.msra.mxu2 %v882_v48  ;;  %924 = vmatpush.msra.mxu3 %v883_v49 }
 0x254   : > { %1058 = vmatmul.msk.f32.vlgmr.msra.gmra.mxu0 %vm288_vm0, %v1057_v51  ;;  %1059 = vmatmul.msk.f32.vlgmr.msra.gmra.mxu1 %vm288_vm0, %v1057_v51  ;;  %v1161_v51 = vld [vmem:[%s1462_s6 + $0x10] ss:$0 sm:$0xff] }
 0x256   : > { %1055 = vmatmul.msk.f32.vlgmr.msrb.gmra.mxu2 %vm288_vm0, %v1054_v50  ;;  %1056 = vmatmul.msk.f32.vlgmr.msrb.gmra.mxu3 %vm288_vm0, %v1054_v50 }
 0x25e   : > { %1061 = vmatmul.msk.f32.vlgmr.msra.gmra.mxu2 %vm288_vm0, %v1060_v52  ;;  %1062 = vmatmul.msk.f32.vlgmr.msra.gmra.mxu3 %vm288_vm0, %v1060_v52  ;;  %v1162_v52 = vld [vmem:[%s1462_s6 + $0x18] ss:$0 sm:$0xff]  ;;  %vm946_vm0 = vcmask 1043456  }
 0x2a1   : > { %v507_v53 = vpop.f32.mrf.mxu0  ;;  %v527_v54 = vpop.f32.mrf.mxu1 }
 0x2a2   : > { %v533_v7 = vmul.f32 %v531_v63, %v527_v54  ;;  %v532_v8 = vmul.f32 %v530_v0, %v507_v53 }
 0x2c0   : > { %v449_v55 = vpop.f32.mrf.mxu2  ;;  %v469_v56 = vpop.f32.mrf.mxu3 }
 0x2c1   : > { %v623_v59 = vpop.f32.mrf.mxu0  ;;  %v643_v60 = vpop.f32.mrf.mxu1  ;;  %v474_v5 = vmul.f32 %v472_v61, %v449_v55  ;;  %v475_v6 = vmul.f32 %v473_v62, %v469_v56 }
 0x2c2   : > { %v648_v23 = vmul.f32 %v646_v11, %v623_v59  ;;  %v649_v24 = vmul.f32 %v647_v12, %v643_v60  ;;  %v939_v61 = vpop.permute.xlu1 %938 }
 0x2c3   : > { %v535_v13 = vadd.f32 %v533_v7, %v475_v6  ;;  %v534_v14 = vadd.f32 %v532_v8, %v474_v5 }
 0x2c8   : > { %v565_v1 = vpop.f32.mrf.mxu2  ;;  %v585_v2 = vpop.f32.mrf.mxu3 }
 0x2c9   : > { %v590_v9 = vmul.f32 %v588_v3, %v565_v1  ;;  %v591_v10 = vmul.f32 %v589_v4, %v585_v2  ;;  %v732_v17 = vpop.f32.mrf.mxu0  ;;  %v752_v18 = vpop.f32.mrf.mxu1 }
 0x2ca   : > { %v757_v35 = vmul.f32 %v755_v27, %v732_v17  ;;  %v758_v36 = vmul.f32 %v756_v28, %v752_v18 }
 0x2cb   : > { %v592_v21 = vadd.f32 %v590_v9, %v534_v14  ;;  %v593_v22 = vadd.f32 %v591_v10, %v535_v13 }
 0x2cd   : > { %v650_v29 = vadd.f32 %v648_v23, %v592_v21  ;;  %v651_v30 = vadd.f32 %v649_v24, %v593_v22 }
 0x2d1   : > { %v674_v19 = vpop.f32.mrf.mxu2  ;;  %v694_v20 = vpop.f32.mrf.mxu3 }
 0x2d2   : > { %v699_v25 = vmul.f32 %v697_v15, %v674_v19  ;;  %v700_v26 = vmul.f32 %v698_v16, %v694_v20  ;;  %v848_v43 = vpop.f32.mrf.mxu0  ;;  %v868_v44 = vpop.f32.mrf.mxu1 }
 0x2d3   : > { %v873_v49 = vmul.f32 %v871_v41, %v848_v43  ;;  %v874_v50 = vmul.f32 %v872_v42, %v868_v44 }
 0x2d4   : > { %v701_v33 = vadd.f32 %v699_v25, %v650_v29  ;;  %v702_v34 = vadd.f32 %v700_v26, %v651_v30 }
 0x2d6   : > { %v759_v45 = vadd.f32 %v757_v35, %v701_v33  ;;  %v760_v46 = vadd.f32 %v758_v36, %v702_v34 }
 0x2d9   : > { %v790_v37 = vpop.f32.mrf.mxu2  ;;  %v810_v38 = vpop.f32.mrf.mxu3 }
 0x2da   : > { %v815_v39 = vmul.f32 %v813_v31, %v790_v37  ;;  %v816_v40 = vmul.f32 %v814_v32, %v810_v38 }
 0x2dc   : > { %v817_v47 = vadd.f32 %v815_v39, %v759_v45  ;;  %v818_v48 = vadd.f32 %v816_v40, %v760_v46 }
 0x2de   : > { %v875_v55 = vadd.f32 %v873_v49, %v817_v47  ;;  %v876_v56 = vadd.f32 %v874_v50, %v818_v48 }
 0x2e1   : > { %v906_v53 = vpop.f32.mrf.mxu2  ;;  %v926_v54 = vpop.f32.mrf.mxu3 }
 0x2e2   : > { %v931_v57 = vmul.f32 %v1161_v51, %v906_v53  ;;  %v932_v58 = vmul.f32 %v1162_v52, %v926_v54 }
 0x2e4   : > { %v933_v59 = vadd.f32 %v931_v57, %v875_v55  ;;  %v934_v60 = vadd.f32 %v932_v58, %v876_v56 }
 0x2e6   : > { %v942_v62 = vadd.f32 %v939_v61, %v934_v60  ;;  %v941_v63 = vadd.f32 %v939_v61, %v933_v59 }
 0x2e8   : > { %v945_v0 = vrot.slane %v942_v62, 4 }
 0x2ea   : > { %v947_v1 = vsel %vm946_vm0, %v941_v63, %v945_v0 }
 0x2eb   : > { %949 = vst [vmem:[%s271_s29] sm:$0xff] %v947_v1 }
 0x2ec   : > { %1200 = shalt.err (!%p1197_p3)
}
 0x2ed   : > { %1070 = dma.vmem_to_hbm [thread:$0]  (%p1324_p5), %s965_s8, 128, %s967_s9, %s951_s28  }
 0x2ee PF: > { %p1076_p4 = scmp.ge.s32.totalorder %s1235_s27, 2  ;;  %s978_s14 = sand.u32 1, %s1223_s24  }
 0x2ef   : > { %s979_s21 = scalar_lea.sflag [#allocation3], %s978_s14 }
 0x2f0   : > { %p1073_p7 = pnand %p1076_p4, %p1328_p6 }
 0x2f2   : > { %p1074_p8 = pneg %p1073_p7 }
 0x2f4   : > { %1218 = dma.done.wait (%p1074_p8), %s979_s21, 128  }
 0x2f5   : > { %1220 = vsyncadd (%p1074_p8), %s979_s21, 4294967168  ;;  %p17_p9 = scmp.ge.s32.totalorder %s1311_s30, 4   ;;  %s1466_s24 = smov %s1227_s25 }
 0x2f6   : > { %s1467_s25 = smov %s1231_s26  ;;  %s1468_s26 = smov %s1322_s10 }
 0x2f7   : > { %s1469_s27 = smov %s1311_s30  ;;  %19 = sbr.rel (!%p17_p9) target bundleno = 3 (0x3), region = 91 }
 0x2fc   :  { %985 = vsyncpa [#allocation3], 1 }
 0x2fd   :  { %987 = vsyncpa [#allocation3 + $0x1], 1 }

</bundles_post_ra>
